<compile_context>
chip_gen: v7x
topology: tpu7x:2x2x1
jax: 0.10.0
libtpu: 0.0.40
codegen_flags: <defaults>
</compile_context>

<pallas_src>
import functools

import jax
import jax.numpy as jnp
from jax.experimental import pallas as pl
from jax.experimental.pallas import tpu as pltpu


# ----------------------------- Pallas kernel ------------------------------ #
def _make_conv_bn_act_kernel(Hp, Wp, H_out, KH, Cin, act_type):
    def kernel(x_ref, w_ref, b_ref, o_ref):
        # x_ref: (1, Cin*Hp, Wp)      one zero-padded image (NCHW rows, flat)
        # w_ref: (KH*Cin*Wp, Wo*Cout) bf16 banded weight (BN scale folded in)
        # b_ref: (1, Wo*Cout)         f32 BN shift, tiled lane-dense
        # o_ref: (H_out, Wo*Cout)     lane-dense output slab for this image
        x = x_ref[0]                                        # (Cin*Hp, Wp) f32

        # In-kernel "im2col": 12 static sublane-window slices, concatenated
        # along lanes. Column order must be (kh, cin, w) to match the banded
        # weight's row order. No HBM round-trip, no per-tap matmul.
        pieces = []
        for kh in range(KH):
            for ci in range(Cin):
                r0 = ci * Hp + kh
                pieces.append(x[r0:r0 + H_out, :])          # (H_out, Wp)
        lhs = jnp.concatenate(pieces, axis=1)               # (H_out, KH*Cin*Wp)

        # Single MXU dot in bf16, f32 accumulation; result is already the
        # lane-dense slab (no post-dot relayout).
        y = jnp.dot(lhs.astype(jnp.bfloat16), w_ref[...],
                    preferred_element_type=jnp.float32)     # (H_out, Wo*Cout)
        y = y + b_ref[...]                                  # BN shift (f32)
        if act_type == "ReLU":
            y = jnp.maximum(y, 0.0)
        elif act_type == "Sigmoid":
            y = jax.nn.sigmoid(y)
        elif act_type is None:
            pass
        else:
            raise NotImplementedError(act_type)
        o_ref[...] = y.astype(o_ref.dtype)

    return kernel


# -------------------------------- wrapper ---------------------------------- #
def conv_module_forward(x_nchw, weight_hwio, bn_scale, bn_bias, *,
                        stride=1, padding=1, dilation=1, groups=1,
                        act_type="ReLU"):
    """Forward of ConvModule. x_nchw: [N, Cin, H, W] (PyTorch layout)."""
    # TODO(synk): only stride=1, dilation=1, groups=1 implemented (the module
    # defaults / this config); training-mode BN statistics are not computed.
    assert stride == 1 and dilation == 1 and groups == 1
    N, Cin, H, W = x_nchw.shape
    KH, KW, Cin_w, Cout = weight_hwio.shape
    assert Cin == Cin_w

    Hp, Wp = H + 2 * padding, W + 2 * padding
    H_out, W_out = Hp - KH + 1, Wp - KW + 1
    K_dim = KH * Cin * Wp            # matmul contraction length (216)
    L_out = W_out * Cout             # output lane width (128 -> unmasked vst)

    # --- input glue: zero-pad + flatten. No layout transpose (stays NCHW). ---
    xp = jnp.pad(x_nchw, ((0, 0), (0, 0),
                          (padding, padding), (padding, padding)))
    xr = xp.reshape(N, Cin * Hp, Wp).astype(jnp.float32)     # (N, 72, 18)

    # --- banded (Toeplitz-along-W) weight so one dot emits the slab ---------
    # wb[(kh,ci,w), (wo,co)] = weight[kh, w-wo, ci, co] * bn_scale[co]
    #                          if 0 <= w - wo < KW else 0
    # In a real model this is a one-time (init) transform, ~55 KB in bf16.
    w_scaled = (weight_hwio.astype(jnp.float32)
                * bn_scale.astype(jnp.float32)[None, None, None, :])
    w_ar = jnp.arange(Wp)[:, None, None]
    wo_ar = jnp.arange(W_out)[None, :, None]
    kw_ar = jnp.arange(KW)[None, None, :]
    band = (w_ar == wo_ar + kw_ar).astype(jnp.float32)       # (Wp, Wo, KW)
    wb = jnp.einsum("wok,hkic->hiwoc", band, w_scaled)       # (KH,Cin,Wp,Wo,Co)
    wb = wb.reshape(K_dim, L_out).astype(jnp.bfloat16)       # (216, 128)

    # BN shift, tiled lane-dense (kept f32; one broadcast add in-kernel).
    bias_tiled = jnp.tile(bn_bias.astype(jnp.float32), W_out).reshape(1, L_out)

    kernel = _make_conv_bn_act_kernel(Hp, Wp, H_out, KH, Cin, act_type)

    out_slab = pl.pallas_call(
        kernel,
        out_shape=jax.ShapeDtypeStruct((N * H_out, L_out), x_nchw.dtype),
        grid_spec=pltpu.PrefetchScalarGridSpec(
            num_scalar_prefetch=0,
            grid=(N,),                                  # one image per step
            in_specs=[
                pl.BlockSpec((1, Cin * Hp, Wp), lambda n: (n, 0, 0)),
                pl.BlockSpec((K_dim, L_out), lambda n: (0, 0)),
                pl.BlockSpec((1, L_out), lambda n: (0, 0)),
            ],
            out_specs=pl.BlockSpec((H_out, L_out), lambda n: (n, 0)),
        ),
        compiler_params=pltpu.CompilerParams(
            dimension_semantics=("parallel",)),          # v7x: one image per TC
    )(xr, wb, bias_tiled)

    # Lane-dense slab -> NCHW (PyTorch output convention). Single 16 KB fusion.
    out_nhwc = out_slab.reshape(N, H_out, W_out, Cout)
    return jnp.transpose(out_nhwc, (0, 3, 1, 2))


# --------------------------- pure-JAX reference ---------------------------- #
def _reference(x_nchw, weight_hwio, bn_scale, bn_bias, padding, act_type):
    x = jnp.transpose(x_nchw, (0, 2, 3, 1)).astype(jnp.float32)
    y = jax.lax.conv_general_dilated(
        x, weight_hwio.astype(jnp.float32), window_strides=(1, 1),
        padding=[(padding, padding), (padding, padding)],
        dimension_numbers=("NHWC", "HWIO", "NHWC"),
        preferred_element_type=jnp.float32)
    y = y * bn_scale.reshape(1, 1, 1, -1) + bn_bias.reshape(1, 1, 1, -1)
    if act_type == "ReLU":
        y = jnp.maximum(y, 0.0)
    elif act_type == "Sigmoid":
        y = jax.nn.sigmoid(y)
    return jnp.transpose(y, (0, 3, 1, 2)).astype(x_nchw.dtype)


# --------------------------------- main ------------------------------------ #
if __name__ == "__main__":
    key = jax.random.PRNGKey(0)
    k_x, k_w, k_g, k_b, k_m, k_v = jax.random.split(key, 6)

    N, Cin, H, W = 2, 4, 16, 16
    Cout, K = 8, 3
    padding = 1
    eps = 1e-5

    x = jax.random.normal(k_x, (N, Cin, H, W), jnp.float32)

    # Deterministic parameter init (conv has no bias since use_bn=True).
    weight_hwio = jax.random.normal(k_w, (K, K, Cin, Cout), jnp.float32) * 0.1
    gamma = 1.0 + 0.1 * jax.random.normal(k_g, (Cout,), jnp.float32)
    beta = 0.1 * jax.random.normal(k_b, (Cout,), jnp.float32)
    run_mean = 0.1 * jax.random.normal(k_m, (Cout,), jnp.float32)
    run_var = jnp.abs(jax.random.normal(k_v, (Cout,), jnp.float32)) + 0.5

    # Fold eval-mode BatchNorm into per-channel scale/shift.
    bn_scale = gamma / jnp.sqrt(run_var + eps)
    bn_bias = beta - run_mean * bn_scale

    fwd = jax.jit(functools.partial(conv_module_forward, stride=1,
                                    padding=padding, act_type="ReLU"))
    out = jax.block_until_ready(fwd(x, weight_hwio, bn_scale, bn_bias))

    ref = _reference(x, weight_hwio, bn_scale, bn_bias, padding, "ReLU")
    assert out.shape == (N, Cout, H, W), out.shape
    max_err = float(jnp.max(jnp.abs(out.astype(jnp.float32)
                                    - ref.astype(jnp.float32))))
    # bf16 matmul operands vs f32 reference -> tolerance loosened per review.
    assert max_err < 5e-2, max_err

    print("KERNEL_OK")
</pallas_src>

<mosaic_0001>
module attributes {stable_mosaic.version = 11 : i64} {
  func.func @kernel(%arg0: i32, %arg1: memref<1x72x18xf32, #tpu.memory_space<vmem>>, %arg2: memref<216x128xbf16, #tpu.memory_space<vmem>>, %arg3: memref<1x128xf32, #tpu.memory_space<vmem>>, %arg4: memref<16x128xf32, #tpu.memory_space<vmem>>) attributes {dimension_semantics = [#tpu.dimension_semantics<parallel>], iteration_bounds = array<i64: 2>, scalar_prefetch = 0 : i64, scratch_operands = 0 : i64, tpu.core_type = #tpu.core_type<tc>, window_params = [{transform_indices = @transform_0, window_bounds = array<i64: 1, 72, 18>}, {pipeline_mode = #tpu.pipeline_mode<synchronous>, transform_indices = @transform_1, window_bounds = array<i64: 216, 128>}, {pipeline_mode = #tpu.pipeline_mode<synchronous>, transform_indices = @transform_2, window_bounds = array<i64: 1, 128>}, {transform_indices = @transform_3, window_bounds = array<i64: 16, 128>}]} {
    %c0 = arith.constant 0 : index
    %c0_0 = arith.constant 0 : index
    %c0_1 = arith.constant 0 : index
    %0 = vector.load %arg1[%c0, %c0_0, %c0_1] : memref<1x72x18xf32, #tpu.memory_space<vmem>>, vector<1x72x18xf32>
    %1 = vector.shape_cast %0 : vector<1x72x18xf32> to vector<72x18xf32>
    %2 = vector.extract_strided_slice %1 {offsets = [0, 0], sizes = [16, 18], strides = [1, 1]} : vector<72x18xf32> to vector<16x18xf32>
    %3 = vector.extract_strided_slice %1 {offsets = [18, 0], sizes = [16, 18], strides = [1, 1]} : vector<72x18xf32> to vector<16x18xf32>
    %4 = vector.extract_strided_slice %1 {offsets = [36, 0], sizes = [16, 18], strides = [1, 1]} : vector<72x18xf32> to vector<16x18xf32>
    %5 = vector.extract_strided_slice %1 {offsets = [54, 0], sizes = [16, 18], strides = [1, 1]} : vector<72x18xf32> to vector<16x18xf32>
    %6 = vector.extract_strided_slice %1 {offsets = [1, 0], sizes = [16, 18], strides = [1, 1]} : vector<72x18xf32> to vector<16x18xf32>
    %7 = vector.extract_strided_slice %1 {offsets = [19, 0], sizes = [16, 18], strides = [1, 1]} : vector<72x18xf32> to vector<16x18xf32>
    %8 = vector.extract_strided_slice %1 {offsets = [37, 0], sizes = [16, 18], strides = [1, 1]} : vector<72x18xf32> to vector<16x18xf32>
    %9 = vector.extract_strided_slice %1 {offsets = [55, 0], sizes = [16, 18], strides = [1, 1]} : vector<72x18xf32> to vector<16x18xf32>
    %10 = vector.extract_strided_slice %1 {offsets = [2, 0], sizes = [16, 18], strides = [1, 1]} : vector<72x18xf32> to vector<16x18xf32>
    %11 = vector.extract_strided_slice %1 {offsets = [20, 0], sizes = [16, 18], strides = [1, 1]} : vector<72x18xf32> to vector<16x18xf32>
    %12 = vector.extract_strided_slice %1 {offsets = [38, 0], sizes = [16, 18], strides = [1, 1]} : vector<72x18xf32> to vector<16x18xf32>
    %13 = vector.extract_strided_slice %1 {offsets = [56, 0], sizes = [16, 18], strides = [1, 1]} : vector<72x18xf32> to vector<16x18xf32>
    %14 = tpu.concatenate %2, %3, %4, %5, %6, %7, %8, %9, %10, %11, %12, %13 in 1 : vector<16x18xf32>, vector<16x18xf32>, vector<16x18xf32>, vector<16x18xf32>, vector<16x18xf32>, vector<16x18xf32>, vector<16x18xf32>, vector<16x18xf32>, vector<16x18xf32>, vector<16x18xf32>, vector<16x18xf32>, vector<16x18xf32> -> vector<16x216xf32>
    %15 = arith.truncf %14 : vector<16x216xf32> to vector<16x216xbf16>
    %c0_2 = arith.constant 0 : index
    %c0_3 = arith.constant 0 : index
    %16 = vector.load %arg2[%c0_2, %c0_3] : memref<216x128xbf16, #tpu.memory_space<vmem>>, vector<216x128xbf16>
    %cst = arith.constant dense<0.000000e+00> : vector<16x128xf32>
    %17 = tpu.matmul %15, %16, %cst {dimension_numbers = #tpu.dot_dimension_numbers<[1], [0], [0], [1], [0, 0, 1, 1], [], []>} : vector<16x216xbf16>, vector<216x128xbf16>, vector<16x128xf32> -> vector<16x128xf32>
    %c0_4 = arith.constant 0 : index
    %c0_5 = arith.constant 0 : index
    %18 = vector.load %arg3[%c0_4, %c0_5] : memref<1x128xf32, #tpu.memory_space<vmem>>, vector<1x128xf32>
    %19 = vector.broadcast %18 : vector<1x128xf32> to vector<16x128xf32>
    %20 = arith.addf %17, %19 : vector<16x128xf32>
    %cst_6 = arith.constant 0.000000e+00 : f32
    %21 = vector.broadcast %cst_6 : f32 to vector<16x128xf32>
    %22 = arith.maximumf %20, %21 : vector<16x128xf32>
    %c0_7 = arith.constant 0 : index
    %c0_8 = arith.constant 0 : index
    %23 = vector.load %arg4[%c0_7, %c0_8] : memref<16x128xf32, #tpu.memory_space<vmem>>, vector<16x128xf32>
    tpu.vector_store %arg4[%c0_7, %c0_8], %22 {strides = array<i32>} : memref<16x128xf32, #tpu.memory_space<vmem>>, vector<16x128xf32>,
    return
  }
  func.func @transform_0(%arg0: i32) -> (i32, i32, i32) {
    %c0_i32 = arith.constant 0 : i32
    %c0_i32_0 = arith.constant 0 : i32
    %c0_i32_1 = arith.constant 0 : i32
    return %arg0, %c0_i32, %c0_i32_0 : i32, i32, i32
  }
  func.func @transform_1(%arg0: i32) -> (i32, i32) {
    %c0_i32 = arith.constant 0 : i32
    %c0_i32_0 = arith.constant 0 : i32
    %c0_i32_1 = arith.constant 0 : i32
    return %c0_i32, %c0_i32_0 : i32, i32
  }
  func.func @transform_2(%arg0: i32) -> (i32, i32) {
    %c0_i32 = arith.constant 0 : i32
    %c0_i32_0 = arith.constant 0 : i32
    %c0_i32_1 = arith.constant 0 : i32
    return %c0_i32, %c0_i32_0 : i32, i32
  }
  func.func @transform_3(%arg0: i32) -> (i32, i32) {
    %c0_i32 = arith.constant 0 : i32
    %c0_i32_0 = arith.constant 0 : i32
    return %arg0, %c0_i32 : i32, i32
  }
}

</mosaic_0001>

<bundles_post_ra>
// kernel: tile.8
= control target key start
LH: loop header
LB: loop body
LE: loop exit
PB: predicated region body
PF: predicated region fallthrough
CT: control target
= control target key end

     0   :  { %s28_s0 = inlined_call_operand.vmem [shape: f32[8], index: 0, kind: input, shape index: {}]   ;;  %s29_s1 = inlined_call_operand.vmem [shape: f32[16,8], index: 1, kind: output, shape index: {}]  }
   0x1   :  { %v4_v0 = vld [vmem:[%s28_s0] ss:$0 sm:$0xff] }
   0x2   :  { %5 = vst [vmem:[%s29_s1] sm:$0xff] %v4_v0  ;;  %8 = vst [vmem:[%s29_s1 + $0x8] sm:$0xff] %v4_v0 }

// kernel: tile.9
= control target key start
LH: loop header
LB: loop body
LE: loop exit
PB: predicated region body
PF: predicated region fallthrough
CT: control target
= control target key end

     0   :  { %s131_s10 = smov 120   ;;  %s132_s11 = smov 104   ;;  %vm3_vm0 = vcmask 64512   ;;  %vm9_vm1 = vcmask 1048512   ;;  %vm15_vm2 = vcmask 982912   ;;  %vm21_vm3 = vcmask 917312   ;;  %s207_s0 = inlined_call_operand.vmem [shape: f32[16,8], index: 0, kind: input, shape index: {}]   ;;  %s208_s1 = inlined_call_operand.vmem [shape: f32[1,128], index: 1, kind: output, shape index: {}]  }
   0x1   :  { %v101_v0 = vld [vmem:[%s207_s0 + $0xf] sm:$0x1]   ;;  %v103_v1 = vld [vmem:[%s207_s0 + $0xd] sm:$0x1]   ;;  %v102_v2 = vld [vmem:[%s207_s0 + $0xe] sm:$0x1]  }
   0x2   :  { %7 = vrot.lane.b32.xlu0 %v101_v0, %s131_s10  ;;  %19 = vrot.lane.b32.xlu1 %v103_v1, %s132_s11  ;;  %v104_v3 = vld [vmem:[%s207_s0 + $0xc] sm:$0x1]   ;;  %s133_s16 = smov 112   ;;  %s134_s17 = smov 96   ;;  %v105_v4 = vld [vmem:[%s207_s0 + $0xb] sm:$0x1]  }
   0x3   :  { %v106_v5 = vld [vmem:[%s207_s0 + $0xa] sm:$0x1]   ;;  %v2_v6 = vld [vmem:[%s207_s0] sm:$0x1]   ;;  %s135_s24 = smov 88   ;;  %s136_s25 = smov 80  }
   0x4   :  { %4 = vst.msk [vmem:[#allocation0] sm:$0x1] %vm3_vm0, %v2_v6   ;;  %v107_v7 = vld [vmem:[%s207_s0 + $0x9] sm:$0x1]   ;;  %v108_v8 = vld [vmem:[%s207_s0 + $0x8] sm:$0x1]  }
   0x5   :  { %s137_s30 = smov 72   ;;  %s138_s2 = smov 64   ;;  %v109_v9 = vld [vmem:[%s207_s0 + $0x7] sm:$0x1]   ;;  %v110_v10 = vld [vmem:[%s207_s0 + $0x6] sm:$0x1]  }
   0x6   :  { %13 = vrot.lane.b32.xlu0 %v102_v2, %s133_s16  ;;  %25 = vrot.lane.b32.xlu1 %v104_v3, %s134_s17  ;;  %s139_s7 = smov 56   ;;  %s140_s8 = smov 48   ;;  %v111_v11 = vld [vmem:[%s207_s0 + $0x5] sm:$0x1]   ;;  %v112_v12 = vld [vmem:[%s207_s0 + $0x4] sm:$0x1]  }
   0x7   :  { %s141_s13 = smov 40   ;;  %s142_s14 = smov 32   ;;  %v113_v13 = vld [vmem:[%s207_s0 + $0x3] sm:$0x1]   ;;  %v114_v14 = vld [vmem:[%s207_s0 + $0x2] sm:$0x1]  }
   0x8   :  { %s143_s19 = smov 24   ;;  %s144_s20 = smov 16   ;;  %v115_v15 = vld [vmem:[%s207_s0 + $0x1] sm:$0x1]   ;;  %vm27_vm4 = vcmask 851712   ;;  %vm33_vm5 = vcmask 786112  }
   0x9   :  { %s145_s0 = smov 8   ;;  %vm39_vm6 = vcmask 720512   ;;  %vm45_vm7 = vcmask 654912   ;;  %vm51_vm8 = vcmask 589312   ;;  %vm57_vm9 = vcmask 523712  }
   0xa   :  { %31 = vrot.lane.b32.xlu0 %v105_v4, %s135_s24  ;;  %37 = vrot.lane.b32.xlu1 %v106_v5, %s136_s25  ;;  %vm63_vm10 = vcmask 458112   ;;  %vm69_vm11 = vcmask 392512   ;;  %vm75_vm12 = vcmask 326912   ;;  %vm81_vm13 = vcmask 261312  }
   0xb   :  { %vm87_vm14 = vcmask 195712   ;;  %vm93_vm15 = vcmask 130112  }
   0xe   :  { %43 = vrot.lane.b32.xlu0 %v107_v7, %s137_s30  ;;  %49 = vrot.lane.b32.xlu1 %v108_v8, %s138_s2 }
  0x12   :  { %55 = vrot.lane.b32.xlu0 %v109_v9, %s139_s7  ;;  %61 = vrot.lane.b32.xlu1 %v110_v10, %s140_s8 }
  0x16   :  { %67 = vrot.lane.b32.xlu0 %v111_v11, %s141_s13  ;;  %73 = vrot.lane.b32.xlu1 %v112_v12, %s142_s14 }
  0x1a   :  { %79 = vrot.lane.b32.xlu0 %v113_v13, %s143_s19  ;;  %85 = vrot.lane.b32.xlu1 %v114_v14, %s144_s20 }
  0x1e   :  { %91 = vrot.lane.b32.xlu0 %v115_v15, %s145_s0 }
  0x74   :  { %v8_v16 = vpop.permute.xlu0 %7   ;;  %v20_v17 = vpop.permute.xlu1 %19  }
  0x75   :  { %10 = vst.msk [vmem:[#allocation0] sm:$0x1] %vm9_vm1, %v8_v16  }
  0x78   :  { %v14_v18 = vpop.permute.xlu0 %13   ;;  %v26_v19 = vpop.permute.xlu1 %25  }
  0x79   :  { %16 = vst.msk [vmem:[#allocation0] sm:$0x1] %vm15_vm2, %v14_v18  }
  0x7a   :  { %22 = vst.msk [vmem:[#allocation0] sm:$0x1] %vm21_vm3, %v20_v17  }
  0x7b   :  { %28 = vst.msk [vmem:[#allocation0] sm:$0x1] %vm27_vm4, %v26_v19  }
  0x7c   :  { %v32_v20 = vpop.permute.xlu0 %31   ;;  %v38_v21 = vpop.permute.xlu1 %37  }
  0x7d   :  { %34 = vst.msk [vmem:[#allocation0] sm:$0x1] %vm33_vm5, %v32_v20  }
  0x7e   :  { %40 = vst.msk [vmem:[#allocation0] sm:$0x1] %vm39_vm6, %v38_v21  }
  0x80   :  { %v44_v22 = vpop.permute.xlu0 %43   ;;  %v50_v23 = vpop.permute.xlu1 %49  }
  0x81   :  { %46 = vst.msk [vmem:[#allocation0] sm:$0x1] %vm45_vm7, %v44_v22  }
  0x82   :  { %52 = vst.msk [vmem:[#allocation0] sm:$0x1] %vm51_vm8, %v50_v23  }
  0x84   :  { %v56_v24 = vpop.permute.xlu0 %55   ;;  %v62_v25 = vpop.permute.xlu1 %61  }
  0x85   :  { %58 = vst.msk [vmem:[#allocation0] sm:$0x1] %vm57_vm9, %v56_v24  }
  0x86   :  { %64 = vst.msk [vmem:[#allocation0] sm:$0x1] %vm63_vm10, %v62_v25  }
  0x88   :  { %v68_v26 = vpop.permute.xlu0 %67   ;;  %v74_v27 = vpop.permute.xlu1 %73  }
  0x89   :  { %70 = vst.msk [vmem:[#allocation0] sm:$0x1] %vm69_vm11, %v68_v26  }
  0x8a   :  { %76 = vst.msk [vmem:[#allocation0] sm:$0x1] %vm75_vm12, %v74_v27  }
  0x8c   :  { %v80_v28 = vpop.permute.xlu0 %79   ;;  %v86_v29 = vpop.permute.xlu1 %85  }
  0x8d   :  { %82 = vst.msk [vmem:[#allocation0] sm:$0x1] %vm81_vm13, %v80_v28  }
  0x8e   :  { %88 = vst.msk [vmem:[#allocation0] sm:$0x1] %vm87_vm14, %v86_v29  }
  0x90   :  { %v92_v30 = vpop.permute.xlu0 %91  }
  0x91   :  { %94 = vst.msk [vmem:[#allocation0] sm:$0x1] %vm93_vm15, %v92_v30  }
  0x98   :  { %v98_v31 = vld [vmem:[#allocation0] sm:$0x1] }
  0x99   :  { %100 = vst [vmem:[%s208_s1] sm:$0x1] %v98_v31 }

// kernel: conv_module_forward.1
= control target key start
LH: loop header
LB: loop body
LE: loop exit
PB: predicated region body
PF: predicated region fallthrough
CT: control target
= control target key end

     0   :  { %s725_s12 = smov 0   ;;  %s894_s0 = inlined_call_operand.vmem [shape: f32[2,72,18], index: 0, kind: input, shape index: {}]   ;;  %s895_s1 = inlined_call_operand.vmem [shape: bf16[216,128], index: 1, kind: input, shape index: {}]   ;;  %s896_s2 = inlined_call_operand.vmem [shape: f32[1,128], index: 2, kind: input, shape index: {}]   ;;  %s897_s3 = inlined_call_operand.vmem [shape: f32[32,128], index: 3, kind: output, shape index: {}]  }
   0x1 LB: > { %s731_s13 = sadd.s32 4294967295, %s691_s12   ;;  %p573_p0 = scmp.ge.s32.totalorder %s691_s12, 1  ;;  %s691_s12 = sphi %s725_s12, %s13_s12  }
   0x2   : > { %p137_p1 = scmp.lt.s32.totalorder %s691_s12, 3 }
   0x4   : > { %p138_p2 = pnand %p573_p0, %p137_p1 }
   0x5   : > { %p161_p3 = scmp.lt.s32.totalorder (!%p138_p2), %s731_s13, 1  ;;  %v693_v0 = vmov (!%p138_p2), 0   ;;  %v671_v1 = vld [vmem:[%s895_s1] sm:$0xff] (!%p138_p2)   ;;  %v672_v2 = vld [vmem:[%s895_s1 + $0x8] sm:$0xff] (!%p138_p2)   ;;  %vm213_vm0 = vcmask (!%p138_p2), 1041408   ;;  %vm185_vm1 = vcmask (!%p138_p2), 1045504  }
   0x6   : > { %141 = sbr.rel (%p138_p2) target bundleno = 385 (0x181), region = 32  ;;  %468 = vmatprep.subr.bf16.mxu0 (!%p138_p2), %v693_v0  ;;  %v673_v3 = vld [vmem:[%s895_s1 + $0x10] sm:$0xff] (!%p138_p2)   ;;  %vm263_vm2 = vcmask (!%p138_p2), 1040384   ;;  %vm199_vm3 = vcmask (!%p138_p2), 1043456   ;;  %vm227_vm4 = vcmask (!%p138_p2), 1046528   ;;  %vm239_vm5 = vcmask (!%p138_p2), 1044480  }
   0x7   : > { %469 = vmatpush1.bf16.msra.mxu0 (!%p138_p2), %v671_v1  ;;  %vm251_vm6 = vcmask (!%p138_p2), 1042432   ;;  %v674_v32 = vld [vmem:[%s895_s1 + $0x18] sm:$0xff] (!%p138_p2)   ;;  %s694_s27 = smov (!%p138_p2), 54   ;;  %s695_s28 = smov (!%p138_p2), 18   ;;  %v675_v45 = vld [vmem:[%s895_s1 + $0x20] sm:$0xff] (!%p138_p2)   ;;  %v676_v63 = vld [vmem:[%s895_s1 + $0x28] sm:$0xff] (!%p138_p2)  }
   0x8   : > { %470 = vmatprep.subr.bf16.mxu0 (!%p138_p2), %v693_v0  ;;  %s696_s4 = smov (!%p138_p2), 126   ;;  %s697_s5 = smov (!%p138_p2), 36   ;;  %vm311_vm7 = vcmask (!%p138_p2), 146432   ;;  %vm314_vm8 = vcmask (!%p138_p2), 293888   ;;  %vm332_vm9 = vcmask (!%p138_p2), 130048   ;;  %vm317_vm10 = vcmask (!%p138_p2), 441344  }
   0x9   : > { %s698_s8 = smov (!%p138_p2), 72   ;;  %s699_s9 = smov (!%p138_p2), 16   ;;  %vm320_vm11 = vcmask (!%p138_p2), 588800   ;;  %vm335_vm12 = vcmask (!%p138_p2), 277504   ;;  %vm323_vm13 = vcmask (!%p138_p2), 736256   ;;  %vm326_vm14 = vcmask (!%p138_p2), 883712  }
   0xa   : > { %s701_s15 = smov (!%p138_p2), 34   ;;  %s702_s18 = smov (!%p138_p2), 108   ;;  %vm338_vm15 = vcmask (!%p138_p2), 424960  }
   0xb   : > { %471 = vmatpush1.bf16.msra.mxu0 (!%p138_p2), %v672_v2  ;;  %s703_s19 = smov (!%p138_p2), 52   ;;  %s575_s6 = sshll.u32 (!%p138_p2), %s731_s13, 1 }
   0xc   : > { %472 = vmatprep.subr.bf16.mxu0 (!%p138_p2), %v693_v0  ;;  %p167_p4 = scmp.lt.s32.totalorder (!%p138_p2), %s575_s6, 3 }
   0xd   : > { %s162_s14 = scalar_select %p161_p3, %s731_s13, 1 }
   0xe   : > { %s899_s6 = smov (!%p167_p4, %s575_s6), 3 }
   0xf   : > { %s595_s17 = smul.u32 72, %s162_s14  ;;  %473 = vmatpush1.bf16.msra.mxu0 %v673_v3  ;;  %s700_s14 = smov 90  }
  0x10   : > { %474 = vmatprep.subr.bf16.mxu0 %v693_v0 }
  0x11   : > { %s165_s22 = scalar_lea.vmem %s894_s0, %s595_s17 }
  0x12   : > { %v751_v4 = vld [vmem:[%s165_s22 + $0x30] sm:$0xff]  ;;  %v753_v5 = vld [vmem:[%s165_s22 + $0x38] sm:$0xff]  ;;  %v755_v6 = vld [vmem:[%s165_s22 + $0x40] sm:$0xff] }
  0x13   : > { %v214_v7 = vrot.slane %v751_v4, 6  ;;  %v215_v8 = vrot.slane %v753_v5, 6  ;;  %v217_v9 = vrot.slane %v755_v6, 6  ;;  %v760_v10 = vld [vmem:[%s165_s22 + $0x10] sm:$0xff]  ;;  %v762_v11 = vld [vmem:[%s165_s22 + $0x18] sm:$0xff]  ;;  %v764_v12 = vld [vmem:[%s165_s22 + $0x20] sm:$0xff]  ;;  %475 = vmatpush1.bf16.msra.mxu0 %v674_v32 }
  0x14   : > { %v186_v13 = vrot.slane %v760_v10, 2  ;;  %v187_v14 = vrot.slane %v762_v11, 2  ;;  %v189_v15 = vrot.slane %v764_v12, 2  ;;  %v264_v16 = vrot.slane %v751_v4, 7  ;;  %v770_v17 = vld [vmem:[%s165_s22 + $0x28] sm:$0xff]  ;;  %v779_v22 = vld [vmem:[%s165_s22] sm:$0xff]  ;;  %476 = vmatprep.subr.bf16.mxu0 %v693_v0 }
  0x15   : > { %v216_v18 = vsel %vm213_vm0, %v214_v7, %v215_v8  ;;  %v218_v19 = vsel %vm213_vm0, %v215_v8, %v217_v9  ;;  %v265_v20 = vrot.slane %v753_v5, 7  ;;  %v267_v21 = vrot.slane %v755_v6, 7  ;;  %v781_v23 = vld [vmem:[%s165_s22 + $0x8] sm:$0xff]  ;;  %s704_s22 = smov 70  }
  0x16   : > { %v626_v24 = vpack.i.bf16 %v218_v19, %v216_v18  ;;  %v188_v25 = vsel %vm185_vm1, %v186_v13, %v187_v14  ;;  %v190_v26 = vsel %vm185_vm1, %v187_v14, %v189_v15  ;;  %v200_v27 = vrot.slane %v764_v12, 4  ;;  %v679_v15 = vld [vmem:[%s895_s1 + $0x40] sm:$0xff]   ;;  %v684_v18 = vld [vmem:[%s895_s1 + $0x68] ss:$0 sps:$4 sm:$0xff]  }
  0x17   : > { %v616_v28 = vpack.i.bf16 %v190_v26, %v188_v25  ;;  %v266_v29 = vsel %vm263_vm2, %v264_v16, %v265_v20  ;;  %v268_v30 = vsel %vm263_vm2, %v265_v20, %v267_v21  ;;  %v201_v31 = vrot.slane %v770_v17, 4  ;;  %477 = vmatpush1.bf16.msra.mxu0 %v675_v45  ;;  %v680_v16 = vld [vmem:[%s895_s1 + $0x48] sm:$0xff]  }
  0x18   : > { %627 = vrot.lane.b32.xlu1 %v626_v24, %s694_s27  ;;  %v631_v33 = vpack.i.bf16 %v268_v30, %v266_v29  ;;  %v203_v34 = vrot.slane %v751_v4, 4  ;;  %v275_v35 = vrot.slane %v779_v22, 2  ;;  %v276_v36 = vrot.slane %v781_v23, 2  ;;  %478 = vmatprep.subr.bf16.mxu0 %v693_v0 }
  0x19   : > { %617 = vrot.lane.b32.xlu0 %v616_v28, %s695_s28  ;;  %v202_v37 = vsel %vm199_vm3, %v200_v27, %v201_v31  ;;  %v228_v38 = vrot.slane %v779_v22, 1  ;;  %v229_v39 = vrot.slane %v781_v23, 1  ;;  %v231_v40 = vrot.slane %v760_v10, 1 }
  0x1a   : > { %v204_v41 = vsel %vm199_vm3, %v201_v31, %v203_v34  ;;  %v277_v42 = vsel %vm185_vm1, %v275_v35, %v276_v36  ;;  %v278_v43 = vsel %vm185_vm1, %v276_v36, %v186_v13  ;;  %v285_v44 = vrot.slane %v760_v10, 4 }
  0x1b   : > { %v621_v46 = vpack.i.bf16 %v204_v41, %v202_v37  ;;  %v636_v47 = vpack.i.bf16 %v278_v43, %v277_v42  ;;  %v230_v48 = vsel %vm227_vm4, %v228_v38, %v229_v39  ;;  %v232_v49 = vsel %vm227_vm4, %v229_v39, %v231_v40  ;;  %479 = vmatpush1.bf16.msra.mxu0 %v676_v63 }
  0x1c   : > { %632 = vrot.lane.b32.xlu1 %v631_v33, %s696_s4  ;;  %v641_v50 = vpack.i.bf16 %v232_v49, %v230_v48  ;;  %v286_v51 = vrot.slane %v762_v11, 4  ;;  %v240_v52 = vrot.slane %v760_v10, 3  ;;  %v241_v53 = vrot.slane %v762_v11, 3  ;;  %480 = vmatprep.subr.bf16.mxu0 %v693_v0 }
  0x1d   : > { %622 = vrot.lane.b32.xlu0 %v621_v46, %s697_s5  ;;  %v243_v54 = vrot.slane %v764_v12, 3  ;;  %v295_v55 = vrot.slane %v764_v12, 6  ;;  %v296_v56 = vrot.slane %v770_v17, 6  ;;  %v252_v57 = vrot.slane %v764_v12, 5  ;;  %v677_v12 = vld [vmem:[%s895_s1 + $0x30] sm:$0xff]  }
  0x1e   : > { %v287_v58 = vsel %vm199_vm3, %v285_v44, %v286_v51  ;;  %v288_v59 = vsel %vm199_vm3, %v286_v51, %v200_v27  ;;  %v242_v60 = vsel %vm239_vm5, %v240_v52, %v241_v53  ;;  %v253_v61 = vrot.slane %v770_v17, 5  ;;  %v683_v17 = vld [vmem:[%s895_s1 + $0x60] sm:$0xff]  }
  0x1f   : > { %v244_v62 = vsel %vm239_vm5, %v241_v53, %v243_v54  ;;  %v255_v2 = vrot.slane %v751_v4, 5  ;;  %v646_v3 = vpack.i.bf16 %v288_v59, %v287_v58  ;;  %v297_v9 = vsel %vm213_vm0, %v295_v55, %v296_v56  ;;  %481 = vmatpush1.bf16.msra.mxu0 %v677_v12  ;;  %v678_v4 = vld [vmem:[%s895_s1 + $0x38] sm:$0xff]  }
  0x20   : > { %642 = vrot.lane.b32.xlu1 %v641_v50, %s698_s8  ;;  %v651_v1 = vpack.i.bf16 %v244_v62, %v242_v60  ;;  %v254_v8 = vsel %vm251_vm6, %v252_v57, %v253_v61  ;;  %v298_v10 = vsel %vm213_vm0, %v296_v56, %v214_v7  ;;  %482 = vmatprep.subr.bf16.mxu0 %v693_v0  ;;  %v466_v19 = vsel %vm199_vm3, %v684_v18, 0 }
  0x21   : > { %637 = vrot.lane.b32.xlu0 %v636_v47, %s699_s9  ;;  %v256_v11 = vsel %vm251_vm6, %v253_v61, %v255_v2  ;;  %v656_v14 = vpack.i.bf16 %v298_v10, %v297_v9  ;;  %v666_v7 = vpack.i.bf16 %v755_v6, %v753_v5  ;;  %v681_v5 = vld [vmem:[%s895_s1 + $0x50] sm:$0xff]   ;;  %v682_v6 = vld [vmem:[%s895_s1 + $0x58] sm:$0xff]   ;;  %vm329_vm0 = vcmask 1031168   ;;  %s576_s9 = sshll.u32 %s899_s6, 3 }
  0x22   : > { %v661_v13 = vpack.i.bf16 %v256_v11, %v254_v8  ;;  %vm341_vm1 = vcmask 572416   ;;  %vm461_vm2 = vcmask 719872  }
  0x23   : > { %483 = vmatpush1.bf16.msra.mxu0 %v678_v4 }
  0x24   : > { %652 = vrot.lane.b32.xlu1 %v651_v1, %s700_s14  ;;  %484 = vmatprep.subr.bf16.mxu0 %v693_v0  ;;  %s170_s14 = scalar_lea.vmem %s897_s3, %s576_s9 }
  0x25   : > { %647 = vrot.lane.b32.xlu0 %v646_v3, %s701_s15 }
  0x27   : > { %485 = vmatpush1.bf16.msra.mxu0 %v679_v15  ;;  %v577_v15 = vld [vmem:[%s896_s2] ss:$0 sm:$0xff] }
  0x28   : > { %662 = vrot.lane.b32.xlu1 %v661_v13, %s702_s18  ;;  %486 = vmatprep.subr.bf16.mxu0 %v693_v0 }
  0x29   : > { %657 = vrot.lane.b32.xlu0 %v656_v14, %s703_s19 }
  0x2b   : > { %487 = vmatpush1.bf16.msra.mxu0 %v680_v16 }
  0x2c   : > { %488 = vmatprep.subr.bf16.mxu0 %v693_v0 }
  0x2d   : > { %667 = vrot.lane.b32.xlu0 %v666_v7, %s704_s22 }
  0x2f   : > { %489 = vmatpush1.bf16.msra.mxu0 %v681_v5 }
  0x30   : > { %490 = vmatprep.subr.bf16.mxu0 %v693_v0 }
  0x33   : > { %491 = vmatpush1.bf16.msra.mxu0 %v682_v6 }
  0x34   : > { %492 = vmatprep.subr.bf16.mxu0 %v693_v0 }
  0x37   : > { %493 = vmatpush1.bf16.msra.mxu0 %v683_v17 }
  0x38   : > { %494 = vmatprep.subr.bf16.mxu0 %v693_v0 }
  0x3b   : > { %495 = vmatpush1.bf16.msra.mxu0 %v466_v19 }
  0x8a   : > { %v628_v20 = vpop.permute.xlu1 %627 }
  0x8b   : > { %v618_v21 = vpop.permute.xlu0 %617  ;;  %v630_v32 = vunpack.i.h.bf16 %v628_v20  ;;  %v629_v33 = vunpack.i.l.bf16 %v628_v20 }
  0x8c   : > { %v620_v26 = vunpack.i.h.bf16 %v618_v21  ;;  %v619_v27 = vunpack.i.l.bf16 %v618_v21 }
  0x8e   : > { %v868_v24 = vpop.permute.xlu1 %632  ;;  %v312_v0 = vsel %vm311_vm7, %v779_v22, %v619_v27  ;;  %v313_v34 = vsel %vm311_vm7, %v781_v23, %v620_v26 }
  0x8f   : > { %v623_v25 = vpop.permute.xlu0 %622  ;;  %v635_v43 = vunpack.i.h.bf16 %v868_v24  ;;  %v634_v22 = vunpack.i.l.bf16 %v868_v24 }
  0x90   : > { %v625_v29 = vunpack.i.h.bf16 %v623_v25  ;;  %v624_v30 = vunpack.i.l.bf16 %v623_v25 }
  0x92   : > { %v643_v28 = vpop.permute.xlu1 %642  ;;  %v315_v36 = vsel %vm314_vm8, %v312_v0, %v624_v30  ;;  %v316_v37 = vsel %vm314_vm8, %v313_v34, %v625_v29 }
  0x93   : > { %v638_v31 = vpop.permute.xlu0 %637  ;;  %v645_v39 = vunpack.i.h.bf16 %v643_v28  ;;  %v644_v40 = vunpack.i.l.bf16 %v643_v28  ;;  %v318_v44 = vsel %vm317_vm10, %v315_v36, %v629_v33  ;;  %v319_v23 = vsel %vm317_vm10, %v316_v37, %v630_v32 }
  0x94   : > { %v640_v46 = vunpack.i.h.bf16 %v638_v31  ;;  %v639_v47 = vunpack.i.l.bf16 %v638_v31 }
  0x95   : > { %v322_v51 = vsel %vm320_vm11, %v319_v23, %v645_v39  ;;  %v321_v52 = vsel %vm320_vm11, %v318_v44, %v644_v40 }
  0x96   : > { %v653_v35 = vpop.permute.xlu1 %652  ;;  %v334_v61 = vsel %vm332_vm9, %v635_v43, %v640_v46  ;;  %v333_v62 = vsel %vm332_vm9, %v634_v22, %v639_v47 }
  0x97   : > { %v648_v38 = vpop.permute.xlu0 %647  ;;  %v655_v41 = vunpack.i.h.bf16 %v653_v35  ;;  %v654_v42 = vunpack.i.l.bf16 %v653_v35 }
  0x98   : > { %v650_v53 = vunpack.i.h.bf16 %v648_v38  ;;  %v649_v54 = vunpack.i.l.bf16 %v648_v38 }
  0x99   : > { %v324_v55 = vsel %vm323_vm13, %v321_v52, %v654_v42  ;;  %v325_v56 = vsel %vm323_vm13, %v322_v51, %v655_v41 }
  0x9a   : > { %v663_v45 = vpop.permute.xlu1 %662  ;;  %v336_v1 = vsel %vm335_vm12, %v333_v62, %v649_v54  ;;  %v337_v2 = vsel %vm335_vm12, %v334_v61, %v650_v53 }
  0x9b   : > { %v658_v48 = vpop.permute.xlu0 %657  ;;  %v665_v49 = vunpack.i.h.bf16 %v663_v45  ;;  %v664_v50 = vunpack.i.l.bf16 %v663_v45 }
  0x9c   : > { %v660_v57 = vunpack.i.h.bf16 %v658_v48  ;;  %v659_v58 = vunpack.i.l.bf16 %v658_v48 }
  0x9d   : > { %v327_v59 = vsel %vm326_vm14, %v324_v55, %v664_v50  ;;  %v328_v60 = vsel %vm326_vm14, %v325_v56, %v665_v49 }
  0x9e   : > { %v339_v9 = vsel %vm338_vm15, %v336_v1, %v659_v58  ;;  %v340_v10 = vsel %vm338_vm15, %v337_v2, %v660_v57  ;;  %v330_v11 = vsel %vm329_vm0, %v327_v59, %v634_v22  ;;  %v331_v12 = vsel %vm329_vm0, %v328_v60, %v635_v43 }
  0x9f   : > { %v668_v63 = vpop.permute.xlu0 %667  ;;  %v344_v7 = vpack.c.bf16 %v331_v12, %v330_v11 }
  0xa0   : > { %v670_v3 = vunpack.i.h.bf16 %v668_v63  ;;  %v669_v8 = vunpack.i.l.bf16 %v668_v63 }
  0xa2   : > { %v342_v13 = vsel %vm341_vm1, %v339_v9, %v669_v8  ;;  %v343_v14 = vsel %vm341_vm1, %v340_v10, %v670_v3 }
  0xa3   : > { %v345_v4 = vpack.c.bf16 %v343_v14, %v342_v13 }
  0xa5   : > { %592 = vmatprep.mubr.msk.bf16.mxu0 %vm461_vm2, %v345_v4 }
  0xa6   : > { %501 = vmatmul.mubr.bf16.vlgmr.msra.gmra.mrb[0].mxu0 %v344_v7 }
 0x179   : > { %v502_v16 = vpop.f32.mrb[0].mxu0 }
 0x17a   : > { %v503_v5 = vadd.f32 %v577_v15, %v502_v16  ;;  %v504_v6 = vpop.f32.mrb[1].mxu0 }
 0x17b   : > { %v505_v17 = vpop.f32.mrb[2].mxu0 }
 0x17c   : > { %v509_v18 = vmax.f32 %v503_v5, 0.0  ;;  %v506_v19 = vadd.f32 %v577_v15, %v505_v17  ;;  %v507_v20 = vpop.f32.mrb[3].mxu0 }
 0x17e   : > { %511 = vst [vmem:[%s170_s14] sm:$0xff] %v509_v18  ;;  %v510_v21 = vmax.f32 %v506_v19, 0.0 }
 0x180   : > { %512 = vst [vmem:[%s170_s14 + $0x8] sm:$0xff] %v510_v21 }
 0x181 PF: > { %s13_s12 = sadd.s32 1, %s691_s12  }
 0x182   : > { %p10_p5 = scmp.ge.s32.totalorder %s13_s12, 4  }
 0x184   :  { %12 = sbr.rel (!%p10_p5) target bundleno = 1 (0x1), region = 62 }

</bundles_post_ra>
